<compile_context>
chip_gen: v5e
topology: v5e:2x2
jax: 0.10.0
libtpu: 0.0.40
codegen_flags: <defaults>
</compile_context>

<pallas_src>
import functools

import jax
import jax.numpy as jnp
from jax.experimental import pallas as pl
from jax.experimental.pallas import tpu as pltpu


def _round_up(x, m):
    return -(-x // m) * m


def _joints_mse_kernel(pred_ref, gt_ref, w_ref, out_ref, *,
                       use_target_weight, total_rows, block_rows, group,
                       lane_fold):
    """One grid step == one block of rows of the flattened (B*J, HW) heatmaps.

    pred_ref / gt_ref : (block_rows, HW) VMEM tiles
    w_ref             : (block_rows, 1)  VMEM tile (per-row weight)
    out_ref           : (1, group, lane_out) lane-dense per-tile partial sum
    """
    hw = pred_ref.shape[1]
    n_groups = block_rows // group
    has_tail = (total_rows % block_rows) != 0          # static
    row_base = pl.program_id(0) * block_rows

    def group_partial(g):
        start = g * group
        if not isinstance(start, int):                  # fori_loop path
            start = pl.multiple_of(start, group)
        pred = pred_ref[pl.ds(start, group), :].astype(jnp.float32)
        gt = gt_ref[pl.ds(start, group), :].astype(jnp.float32)
        diff = pred - gt
        if use_target_weight:
            w = w_ref[pl.ds(start, group), :].astype(jnp.float32)  # (group, 1)
            diff = diff * w
        sq = diff * diff
        if has_tail:
            # Mask rows past the real row count (overrun blocks hold
            # unspecified data).  where() is NaN/Inf-safe, unlike a 0-multiply.
            rid = (row_base + g * group
                   + jax.lax.broadcasted_iota(jnp.int32, (group, 1), 0))
            sq = jnp.where(rid < total_rows, sq, 0.0)
        if lane_fold:
            # Fold lanes to a single 128-wide vreg column: pure VPU adds on
            # statically aligned slices (no XLU, tiny writeback).
            acc = sq[:, 0:128]
            for c in range(1, hw // 128):
                acc = acc + sq[:, c * 128:(c + 1) * 128]
            return acc
        return sq

    if n_groups <= 16:
        # Short fixed trip count: static unroll for best scheduling.
        acc = group_partial(0)
        for g in range(1, n_groups):
            acc = acc + group_partial(g)
    else:
        acc = jax.lax.fori_loop(
            1, n_groups, lambda g, a: a + group_partial(g), group_partial(0))
    out_ref[0] = acc


def joints_mse_loss(output, target, target_weight, *, use_target_weight=True,
                    target_block_bytes=4 << 20):
    """output/target: (B, J, H, W); target_weight: (B, J, 1). Returns f32 scalar."""
    B, J, H, W = output.shape
    HW = H * W
    rows = B * J

    # Free (row-major) reshapes -- no transposes, no extra HBM traffic.
    pred = output.reshape(rows, HW)
    gt = target.reshape(rows, HW)
    w = target_weight.reshape(rows, 1).astype(jnp.float32)

    isize_p = jnp.dtype(pred.dtype).itemsize
    isize_g = jnp.dtype(gt.dtype).itemsize
    # Row-group size respects the packed sublane tiling of the narrowest input
    # (8 for f32, 16 for bf16, 32 for 8-bit).
    group = max(8, 32 // min(isize_p, isize_g))

    # Pick block_rows purely from the byte budget (multiple of `group`); do NOT
    # require it to divide `rows` -- the tail is masked in-kernel instead.
    bytes_per_row = HW * max(isize_p, isize_g)
    block_rows = max(group, (target_block_bytes // bytes_per_row) // group * group)
    block_rows = min(block_rows, _round_up(rows, group))
    num_tiles = pl.cdiv(rows, block_rows)

    lane_fold = (HW % 128 == 0)
    lane_out = 128 if lane_fold else HW

    kernel = functools.partial(
        _joints_mse_kernel,
        use_target_weight=use_target_weight,
        total_rows=rows,
        block_rows=block_rows,
        group=group,
        lane_fold=lane_fold,
    )

    heatmap_spec = pl.BlockSpec((block_rows, HW), lambda i: (i, 0))
    weight_spec = pl.BlockSpec((block_rows, 1), lambda i: (i, 0))

    # 2 heatmap inputs x 2 pipeline buffers x tile bytes, plus slack.  Keep at
    # least the common 32 MiB scoped default; stays within v7x's 64 MiB VMEM.
    tile_bytes = block_rows * HW * max(isize_p, isize_g)
    vmem_limit = int(min(64 << 20, max(32 << 20, 4 * tile_bytes + (4 << 20))))

    cost = pl.CostEstimate(
        flops=4 * rows * HW,
        transcendentals=0,
        bytes_accessed=(rows * HW * (isize_p + isize_g) + rows * 4
                        + num_tiles * group * lane_out * 4),
    )

    partials = pl.pallas_call(
        kernel,
        out_shape=jax.ShapeDtypeStruct((num_tiles, group, lane_out), jnp.float32),
        grid=(num_tiles,),
        in_specs=[heatmap_spec, heatmap_spec, weight_spec],
        out_specs=pl.BlockSpec((1, group, lane_out), lambda i: (i, 0, 0)),
        compiler_params=pltpu.CompilerParams(
            dimension_semantics=("parallel",),
            vmem_limit_bytes=vmem_limit,
        ),
        cost_estimate=cost,
    )(pred, gt, w)

    # Tiny finishing reduction + one scaling by 1/(B*HW).
    return jnp.sum(partials) * jnp.float32(1.0 / (B * HW))


def _reference_loss(output, target, target_weight, use_target_weight=True):
    """Pure-JAX mirror of the given PyTorch forward (for verification)."""
    B, J = output.shape[0], output.shape[1]
    pred = output.reshape(B, J, -1)
    gt = target.reshape(B, J, -1)
    loss = jnp.float32(0.0)
    for idx in range(J):
        hp = pred[:, idx, :]
        hg = gt[:, idx, :]
        if use_target_weight:
            wj = target_weight[:, idx]  # (B, 1)
            loss = loss + jnp.mean((hp * wj - hg * wj) ** 2)
        else:
            loss = loss + jnp.mean((hp - hg) ** 2)
    return loss


if __name__ == "__main__":
    key = jax.random.PRNGKey(0)
    k1, k2, k3 = jax.random.split(key, 3)

    # Small canonical shape.
    B, J, H, W = 2, 4, 16, 16
    output = jax.random.normal(k1, (B, J, H, W), dtype=jnp.float32)
    target = jax.random.normal(k2, (B, J, H, W), dtype=jnp.float32)
    target_weight = jax.random.uniform(k3, (B, J, 1), dtype=jnp.float32)

    loss = jax.block_until_ready(
        joints_mse_loss(output, target, target_weight, use_target_weight=True))
    ref = _reference_loss(output, target, target_weight, True)
    assert jnp.allclose(loss, ref, rtol=1e-5, atol=1e-6), (loss, ref)

    loss_nw = jax.block_until_ready(
        joints_mse_loss(output, target, target_weight, use_target_weight=False))
    ref_nw = _reference_loss(output, target, target_weight, False)
    assert jnp.allclose(loss_nw, ref_nw, rtol=1e-5, atol=1e-6), (loss_nw, ref_nw)

    # Ragged rows (24 rows, forced 16-row blocks): exercises multi-tile grid,
    # multi-group streaming and the in-kernel tail mask (no heatmap padding).
    o2 = jax.random.normal(k1, (3, 8, H, W), dtype=jnp.float32)
    t2 = jax.random.normal(k2, (3, 8, H, W), dtype=jnp.float32)
    w2 = jax.random.uniform(k3, (3, 8, 1), dtype=jnp.float32)
    loss2 = jax.block_until_ready(
        joints_mse_loss(o2, t2, w2, use_target_weight=True,
                        target_block_bytes=16 << 10))
    ref2 = _reference_loss(o2, t2, w2, True)
    assert jnp.allclose(loss2, ref2, rtol=1e-5, atol=1e-6), (loss2, ref2)

    # Larger block (20 groups): exercises the fori_loop streaming path + tail.
    o3 = jax.random.normal(k1, (25, 8, H, W), dtype=jnp.float32)
    t3 = jax.random.normal(k2, (25, 8, H, W), dtype=jnp.float32)
    w3 = jax.random.uniform(k3, (25, 8, 1), dtype=jnp.float32)
    loss3 = jax.block_until_ready(
        joints_mse_loss(o3, t3, w3, use_target_weight=True,
                        target_block_bytes=160 << 10))
    ref3 = _reference_loss(o3, t3, w3, True)
    assert jnp.allclose(loss3, ref3, rtol=1e-5, atol=1e-6), (loss3, ref3)

    print("KERNEL_OK")
</pallas_src>

<mosaic_0001>
module attributes {stable_mosaic.version = 11 : i64} {
  func.func @_joints_mse_kernel(%arg0: i32, %arg1: memref<8x256xf32, #tpu.memory_space<vmem>>, %arg2: memref<8x256xf32, #tpu.memory_space<vmem>>, %arg3: memref<8x1xf32, #tpu.memory_space<vmem>>, %arg4: memref<1x8x128xf32, #tpu.memory_space<vmem>>) attributes {dimension_semantics = [#tpu.dimension_semantics<parallel>], iteration_bounds = array<i64: 1>, scalar_prefetch = 0 : i64, scratch_operands = 0 : i64, tpu.core_type = #tpu.core_type<tc>, window_params = [{transform_indices = @transform_0, window_bounds = array<i64: 8, 256>}, {transform_indices = @transform_1, window_bounds = array<i64: 8, 256>}, {transform_indices = @transform_2, window_bounds = array<i64: 8, 1>}, {transform_indices = @transform_3, window_bounds = array<i64: 1, 8, 128>}]} {
    %c0 = arith.constant 0 : index
    %c0_0 = arith.constant 0 : index
    %0 = vector.load %arg1[%c0, %c0_0] : memref<8x256xf32, #tpu.memory_space<vmem>>, vector<8x256xf32>
    %c0_1 = arith.constant 0 : index
    %c0_2 = arith.constant 0 : index
    %1 = vector.load %arg2[%c0_1, %c0_2] : memref<8x256xf32, #tpu.memory_space<vmem>>, vector<8x256xf32>
    %2 = arith.subf %0, %1 : vector<8x256xf32>
    %c0_3 = arith.constant 0 : index
    %c0_4 = arith.constant 0 : index
    %3 = vector.load %arg3[%c0_3, %c0_4] : memref<8x1xf32, #tpu.memory_space<vmem>>, vector<8x1xf32>
    %4 = vector.broadcast %3 : vector<8x1xf32> to vector<8x256xf32>
    %5 = arith.mulf %2, %4 : vector<8x256xf32>
    %6 = arith.mulf %5, %5 : vector<8x256xf32>
    %7 = vector.extract_strided_slice %6 {offsets = [0, 0], sizes = [8, 128], strides = [1, 1]} : vector<8x256xf32> to vector<8x128xf32>
    %8 = vector.extract_strided_slice %6 {offsets = [0, 128], sizes = [8, 128], strides = [1, 1]} : vector<8x256xf32> to vector<8x128xf32>
    %9 = arith.addf %7, %8 : vector<8x128xf32>
    %c0_5 = arith.constant 0 : index
    %c0_6 = arith.constant 0 : index
    %c0_7 = arith.constant 0 : index
    %10 = vector.load %arg4[%c0_5, %c0_6, %c0_7] : memref<1x8x128xf32, #tpu.memory_space<vmem>>, vector<1x8x128xf32>
    %11 = vector.shape_cast %10 : vector<1x8x128xf32> to vector<8x128xf32>
    %12 = vector.shape_cast %9 : vector<8x128xf32> to vector<1x8x128xf32>
    tpu.vector_store %arg4[%c0_5, %c0_6, %c0_7], %12 {strides = array<i32>} : memref<1x8x128xf32, #tpu.memory_space<vmem>>, vector<1x8x128xf32>,
    return
  }
  func.func @transform_0(%arg0: i32) -> (i32, i32) {
    %c0_i32 = arith.constant 0 : i32
    %c0_i32_0 = arith.constant 0 : i32
    return %arg0, %c0_i32 : i32, i32
  }
  func.func @transform_1(%arg0: i32) -> (i32, i32) {
    %c0_i32 = arith.constant 0 : i32
    %c0_i32_0 = arith.constant 0 : i32
    return %arg0, %c0_i32 : i32, i32
  }
  func.func @transform_2(%arg0: i32) -> (i32, i32) {
    %c0_i32 = arith.constant 0 : i32
    %c0_i32_0 = arith.constant 0 : i32
    return %arg0, %c0_i32 : i32, i32
  }
  func.func @transform_3(%arg0: i32) -> (i32, i32, i32) {
    %c0_i32 = arith.constant 0 : i32
    %c0_i32_0 = arith.constant 0 : i32
    %c0_i32_1 = arith.constant 0 : i32
    return %arg0, %c0_i32, %c0_i32_0 : i32, i32, i32
  }
}

</mosaic_0001>

<bundles_post_ra>
// kernel: tpu_custom_call.1
= control target key start
LH: loop header
LB: loop body
LE: loop exit
PB: predicated region body
PF: predicated region fallthrough
CT: control target
= control target key end

     0   :  { %8 = vsyncpa [#allocation3], 0  ;;  %s198_s0 = inlined_call_operand.hbm [shape: f32[8,256], index: 0, kind: input, shape index: {}]   ;;  %s199_s1 = inlined_call_operand.hbm [shape: f32[8,256], index: 1, kind: input, shape index: {}]   ;;  %s200_s2 = inlined_call_operand.vmem [shape: f32[8,1], index: 2, kind: input, shape index: {}]   ;;  %s201_s3 = inlined_call_operand.hbm [shape: f32[1,8,128], index: 3, kind: output, shape index: {}]  }
   0x1   :  { %9 = vsyncpa [#allocation6], 0 }
   0x2   :  { %10 = vsyncpa [#allocation4], 0  ;;  %s16_s14 = sshll.u32 %s198_s0, 4  ;;  %s162_s15 = smov [#allocation2]   ;;  %s17_s14 = int_to_ptr.hbm [resolvable:$true] %s16_s14 }
   0x3   :  { %s18_s16 = sshll.u32 %s162_s15, 4  ;;  %s27_s19 = sshll.u32 %s199_s1, 4  ;;  %s19_s16 = int_to_ptr.vmem [resolvable:$true] %s18_s16  ;;  %s28_s19 = int_to_ptr.hbm [resolvable:$true] %s27_s19 }
   0x4   :  { %21 = dma.hbm_to_vmem [thread:$0]  %s17_s14, 256, %s19_s16, [#allocation3]  }
   0x5   :  { %s163_s20 = smov [#allocation5]  }
   0x6   :  { %s29_s21 = sshll.u32 %s163_s20, 4  ;;  %s30_s21 = int_to_ptr.vmem [resolvable:$true] %s29_s21 }
   0x7   :  { %32 = dma.hbm_to_vmem [thread:$0]  %s28_s19, 256, %s30_s21, [#allocation6]  }
   0x8   :  { %156 = dma.done.wait [#allocation3], 256  }
   0x9   :  { %157 = vsyncadd [#allocation3], 4294967040 }
   0xa   :  { %158 = dma.done.wait [#allocation6], 256  }
   0xb   :  { %159 = vsyncadd [#allocation6], 4294967040  ;;  %v164_v0 = vmov 0   ;;  %v49_v1 = vld [vmem:[%s200_s2] sm:$0xff]  ;;  %v44_v3 = vld [vmem:[#allocation2 + $0x8] sm:$0xff]  ;;  %s165_s1 = smov [#allocation7]  }
   0xc   :  { %83 = vset.pattern.permute.xlu0 %v164_v0  ;;  %v43_v2 = vld [vmem:[#allocation2] sm:$0xff]  ;;  %v45_v4 = vld [vmem:[#allocation5] sm:$0xff]  ;;  %v46_v5 = vld [vmem:[#allocation5 + $0x8] sm:$0xff]  ;;  %s66_s23 = sshll.u32 %s165_s1, 4  ;;  %s68_s26 = sshll.u32 %s201_s3, 4  ;;  %s67_s23 = int_to_ptr.vmem [resolvable:$true] %s66_s23  ;;  %s69_s26 = int_to_ptr.hbm [resolvable:$true] %s68_s26 }
   0xd   :  { %52 = vperm.xlu0 %83, %v49_v1   ;;  %v47_v6 = vsub.f32 %v43_v2, %v45_v4  ;;  %v48_v7 = vsub.f32 %v44_v3, %v46_v5 }
  0x7f   :  { %v53_v8 = vpop.permute.xlu0 %52 }
  0x80   :  { %v55_v9 = vmul.f32 %v53_v8, %v47_v6  ;;  %v56_v10 = vmul.f32 %v53_v8, %v48_v7 }
  0x82   :  { %v57_v11 = vmul.f32 %v55_v9, %v55_v9  ;;  %v58_v12 = vmul.f32 %v56_v10, %v56_v10 }
  0x84   :  { %v59_v13 = vadd.f32 %v58_v12, %v57_v11 }
  0x86   :  { %60 = vst [vmem:[#allocation7] sm:$0xff] %v59_v13 }
  0x87   :  { %71 = dma.vmem_to_hbm [thread:$0]  %s67_s23, 128, %s69_s26, [#allocation4]  }
  0x88   :  { %160 = dma.done.wait [#allocation4], 128  }
  0x89   :  { %161 = vsyncadd [#allocation4], 4294967168 }
  0x8a   :  { %76 = vsyncpa [#allocation3], 1 }
  0x8b   :  { %77 = vsyncpa [#allocation6], 1 }
  0x8c   :  { %78 = vsyncpa [#allocation4], 1 }

</bundles_post_ra>
